<compile_context>
chip_gen: v5e
topology: v5e:2x2
jax: 0.10.0
libtpu: 0.0.40
codegen_flags: <defaults>
</compile_context>

<pallas_src>
import numpy as np
import jax
import jax.numpy as jnp
from jax.experimental import pallas as pl
from jax.experimental.pallas import tpu as pltpu


# ---------------------------------------------------------------------------
# tiling helpers
# ---------------------------------------------------------------------------
def _pick_row_tile(rows, max_tile=1024):
    """Largest tile <= max_tile dividing `rows` and a multiple of 8, else full."""
    for t in (1024, 512, 256, 128, 64, 32, 16, 8):
        if t <= max_tile and rows % t == 0:
            return t
    return rows


def _pick_lane_tile(cols, max_tile=1024):
    """Largest tile <= max_tile dividing `cols` and a multiple of 128, else full."""
    for t in (1024, 512, 256, 128):
        if t <= max_tile and cols % t == 0:
            return t
    return cols


# ---------------------------------------------------------------------------
# Pallas kernels
# ---------------------------------------------------------------------------
def _proj_cf_kernel(w_ref, x_ref, o_ref):
    # channel-first projection:  out[b] = W (E, C) @ x[b] (C, P)
    o_ref[0] = jnp.dot(w_ref[...], x_ref[0], preferred_element_type=jnp.float32)


def proj_channel_first(wT, x_cf):
    """wT: (E, C), x_cf: (n, C, P)  ->  (n, E, P)   (grid over batch, parallel)."""
    n, C, P = x_cf.shape
    E = wT.shape[0]
    return pl.pallas_call(
        _proj_cf_kernel,
        out_shape=jax.ShapeDtypeStruct((n, E, P), jnp.float32),
        grid=(n,),
        in_specs=[
            pl.BlockSpec((E, C), lambda b: (0, 0)),
            pl.BlockSpec((1, C, P), lambda b: (b, 0, 0)),
        ],
        out_specs=pl.BlockSpec((1, E, P), lambda b: (b, 0, 0)),
        compiler_params=pltpu.CompilerParams(dimension_semantics=("parallel",)),
    )(wT, x_cf)


def _right_matmul_kernel(x_ref, b_ref, o_ref):
    # one separable-upsample pass:  rows @ small interpolation matrix
    o_ref[...] = jnp.dot(x_ref[...], b_ref[...], preferred_element_type=jnp.float32)


def right_matmul(x, b):
    """x: (R, K), b: (K, N) -> (R, N), tiled over rows with a parallel grid."""
    R, K = x.shape
    N = b.shape[1]
    TR = _pick_row_tile(R)
    return pl.pallas_call(
        _right_matmul_kernel,
        out_shape=jax.ShapeDtypeStruct((R, N), jnp.float32),
        grid=(R // TR,),
        in_specs=[
            pl.BlockSpec((TR, K), lambda i: (i, 0)),
            pl.BlockSpec((K, N), lambda i: (0, 0)),
        ],
        out_specs=pl.BlockSpec((TR, N), lambda i: (i, 0)),
        compiler_params=pltpu.CompilerParams(dimension_semantics=("parallel",)),
    )(x, b)


def _fused_head_kernel(x1_ref, u4_ref, u3_ref, u2_ref, wf1_ref,
                       scale_ref, shift_ref, predT_ref, pb_ref, o_ref):
    # pre-BN accumulation: folded c1 projection + three upsampled scales
    s = jnp.dot(wf1_ref[...], x1_ref[0], preferred_element_type=jnp.float32)
    s = s + u4_ref[0] + u3_ref[0] + u2_ref[0]
    # folded BatchNorm (+ folded projection biases) and ReLU
    y = jnp.maximum(s * scale_ref[...] + shift_ref[...], 0.0)
    # linear_pred 1x1 conv, channel-first -> output is already NCHW, lane-dense
    o_ref[0] = jnp.dot(predT_ref[...], y, preferred_element_type=jnp.float32) + pb_ref[...]


def fused_head(x1_cf, u4, u3, u2, wf1T, scale_cf, shift_cf, predT, pred_b_cf):
    n, C1, P = x1_cf.shape
    E = wf1T.shape[0]
    ncls = predT.shape[0]
    TP = _pick_lane_tile(P)
    flops = 2 * n * P * (C1 * E + E * ncls) + 6 * n * P * E
    bytes_accessed = 4 * n * P * (C1 + 3 * E + ncls)
    return pl.pallas_call(
        _fused_head_kernel,
        out_shape=jax.ShapeDtypeStruct((n, ncls, P), jnp.float32),
        grid=(n, P // TP),
        in_specs=[
            pl.BlockSpec((1, C1, TP), lambda b, t: (b, 0, t)),
            pl.BlockSpec((1, E, TP), lambda b, t: (b, 0, t)),
            pl.BlockSpec((1, E, TP), lambda b, t: (b, 0, t)),
            pl.BlockSpec((1, E, TP), lambda b, t: (b, 0, t)),
            pl.BlockSpec((E, C1), lambda b, t: (0, 0)),
            pl.BlockSpec((E, 1), lambda b, t: (0, 0)),
            pl.BlockSpec((E, 1), lambda b, t: (0, 0)),
            pl.BlockSpec((ncls, E), lambda b, t: (0, 0)),
            pl.BlockSpec((ncls, 1), lambda b, t: (0, 0)),
        ],
        out_specs=pl.BlockSpec((1, ncls, TP), lambda b, t: (b, 0, t)),
        compiler_params=pltpu.CompilerParams(
            dimension_semantics=("parallel", "parallel")),
        cost_estimate=pl.CostEstimate(flops=flops, transcendentals=0,
                                      bytes_accessed=bytes_accessed),
    )(x1_cf, u4, u3, u2, wf1T, scale_cf, shift_cf, predT, pred_b_cf)


# ---------------------------------------------------------------------------
# Bilinear interpolation 1-D matrices (PyTorch F.interpolate, align_corners=False)
# ---------------------------------------------------------------------------
def _interp_matrix_1d(out_size, in_size):
    scale = in_size / out_size
    A = np.zeros((out_size, in_size), dtype=np.float32)
    for o in range(out_size):
        src = (o + 0.5) * scale - 0.5
        src = max(src, 0.0)
        i0 = min(int(np.floor(src)), in_size - 1)
        i1 = min(i0 + 1, in_size - 1)
        l1 = src - i0
        A[o, i0] += 1.0 - l1
        A[o, i1] += l1
    return A


# ---------------------------------------------------------------------------
# SegFormerHead forward (Pallas-backed)
# ---------------------------------------------------------------------------
def segformer_head_forward(inputs, params, interp_1d):
    c1 = inputs[0]
    n, C1, H1, W1 = c1.shape
    E = params["proj_w"][0].shape[1]
    ncls = params["pred_w"].shape[1]
    HW = H1 * W1
    f32 = jnp.float32

    # ---- algebraic folding: proj_i -> fuse block for its concat slot ----
    # PyTorch concat order is [_c4, _c3, _c2, _c1] -> scale i uses fuse rows (3-i)*E:(4-i)*E
    fuse_w = params["fuse_w"]
    wfT = []
    bias_const = jnp.zeros((1, E), f32)
    for i in range(4):
        blk = fuse_w[(3 - i) * E:(4 - i) * E, :]              # (E, E)
        wf = params["proj_w"][i] @ blk                        # (C_i, E)
        wfT.append(jnp.asarray(wf.T, f32))                    # (E, C_i)
        bias_const = bias_const + params["proj_b"][i] @ blk   # (1, E)

    bn_scale = params["bn_scale"].reshape(1, E)
    bn_shift = params["bn_shift"].reshape(1, E)
    scale_cf = jnp.asarray(bn_scale.T, f32)                               # (E, 1)
    shift_cf = jnp.asarray((bn_shift + bias_const * bn_scale).T, f32)     # (E, 1)
    predT = jnp.asarray(params["pred_w"].T, f32)                          # (cls, E)
    pred_b_cf = jnp.asarray(params["pred_b"].reshape(1, ncls).T, f32)     # (cls, 1)

    # ---- per-scale upsampled contributions (channel-first, separable bilinear) ----
    contribs = []
    for i in (3, 2, 1):
        x = inputs[i]
        _, C, h, w = x.shape
        p = proj_channel_first(wfT[i], x.reshape(n, C, h * w))    # (n, E, h*w)
        if (h, w) == (H1, W1):
            contribs.append(p.reshape(n, E, HW))
            continue
        A_h, A_w = interp_1d[i]
        # H-upsample (contract h): small transpose on the coarse tensor, then rows @ A_h^T
        p = jnp.transpose(p.reshape(n, E, h, w), (0, 1, 3, 2))    # (n, E, w, h)
        p = right_matmul(p.reshape(n * E * w, h), A_h.T)          # (n*E*w, H1)
        # W-upsample (contract w): transpose on the mid-size tensor, then rows @ A_w^T
        p = jnp.transpose(p.reshape(n, E, w, H1), (0, 1, 3, 2))   # (n, E, H1, w)
        p = right_matmul(p.reshape(n * E * H1, w), A_w.T)         # (n*E*H1, W1)
        contribs.append(p.reshape(n, E, HW))
    u4, u3, u2 = contribs

    # ---- fused: c1 projection + sum + folded BN + ReLU + linear_pred ----
    # TODO(synk): nn.Dropout2d is identity in eval mode; training-mode RNG dropout not implemented.
    logits = fused_head(c1.reshape(n, C1, HW), u4, u3, u2, wfT[0],
                        scale_cf, shift_cf, predT, pred_b_cf)
    return logits.reshape(n, ncls, H1, W1)                        # already NCHW


# ---------------------------------------------------------------------------
# Pure-JAX reference (mirrors the PyTorch module structure) for correctness
# ---------------------------------------------------------------------------
def reference_forward(inputs, params, interp_1d):
    c1 = inputs[0]
    n = c1.shape[0]
    H1, W1 = c1.shape[2], c1.shape[3]
    E = params["proj_w"][0].shape[1]
    ncls = params["pred_w"].shape[1]

    ups = []
    for i in (3, 2, 1, 0):
        x = inputs[i]
        _, c, h, w = x.shape
        tokens = jnp.transpose(x, (0, 2, 3, 1))                        # (n, h, w, C)
        proj = tokens @ params["proj_w"][i] + params["proj_b"][i]      # (n, h, w, E)
        if (h, w) != (H1, W1):
            A_h, A_w = interp_1d[i]
            proj = jnp.einsum("Hh,nhwe->nHwe", A_h, proj)
            proj = jnp.einsum("Ww,nhwe->nhWe", A_w, proj)
        ups.append(proj.reshape(n, H1 * W1, E))
    cat = jnp.concatenate(ups, axis=-1)
    fused = cat @ params["fuse_w"]
    fused = jnp.maximum(fused * params["bn_scale"] + params["bn_shift"], 0.0)
    logits = fused @ params["pred_w"] + params["pred_b"]
    return jnp.transpose(logits.reshape(n, H1, W1, ncls), (0, 3, 1, 2))


# ---------------------------------------------------------------------------
if __name__ == "__main__":
    # Module hyper-parameters (small synthetic configuration)
    num_classes = 6
    in_index = [0, 1, 2, 3]
    in_channels = [8, 16, 32, 64]
    feature_strides = [4, 8, 16, 32]
    embedding_dim = 32
    dropout_ratio = 0.1  # unused in eval mode

    N = 2
    spatial = [(16, 16), (8, 8), (4, 4), (2, 2)]  # c1 .. c4
    H1, W1 = spatial[0]

    key = jax.random.PRNGKey(0)
    keys = jax.random.split(key, 20)

    # Deterministic synthetic inputs (NCHW, like PyTorch)
    inputs = [
        jax.random.normal(keys[i], (N, in_channels[i], h, w), jnp.float32)
        for i, (h, w) in enumerate(spatial)
    ]
    inputs = [inputs[i] for i in in_index]

    # Deterministic synthetic parameters
    E = embedding_dim
    proj_w = [0.1 * jax.random.normal(keys[4 + i], (in_channels[i], E), jnp.float32) for i in range(4)]
    proj_b = [0.1 * jax.random.normal(keys[8 + i], (1, E), jnp.float32) for i in range(4)]
    fuse_w = 0.1 * jax.random.normal(keys[12], (4 * E, E), jnp.float32)
    # BatchNorm2d (eval): fold (gamma, beta, running_mean, running_var, eps) into scale/shift
    gamma = 1.0 + 0.1 * jax.random.normal(keys[13], (1, E), jnp.float32)
    beta = 0.1 * jax.random.normal(keys[14], (1, E), jnp.float32)
    running_mean = 0.1 * jax.random.normal(keys[15], (1, E), jnp.float32)
    running_var = 1.0 + 0.5 * jax.random.uniform(keys[16], (1, E), jnp.float32)
    eps = 1e-5
    bn_scale = gamma / jnp.sqrt(running_var + eps)
    bn_shift = beta - running_mean * bn_scale
    pred_w = 0.1 * jax.random.normal(keys[17], (E, num_classes), jnp.float32)
    pred_b = 0.1 * jax.random.normal(keys[18], (1, num_classes), jnp.float32)

    params = {
        "proj_w": proj_w,
        "proj_b": proj_b,
        "fuse_w": fuse_w,
        "bn_scale": bn_scale,
        "bn_shift": bn_shift,
        "pred_w": pred_w,
        "pred_b": pred_b,
    }

    # Precomputed separable bilinear interpolation matrices (scales 1..3 upsample)
    interp_1d = {
        i: (jnp.asarray(_interp_matrix_1d(H1, spatial[i][0])),
            jnp.asarray(_interp_matrix_1d(W1, spatial[i][1])))
        for i in (1, 2, 3)
    }

    out = segformer_head_forward(inputs, params, interp_1d)
    out = jax.block_until_ready(out)

    assert out.shape == (N, num_classes, H1, W1), out.shape
    ref = reference_forward(inputs, params, interp_1d)
    np.testing.assert_allclose(np.asarray(out), np.asarray(ref), rtol=1e-4, atol=1e-4)

    print("KERNEL_OK")
</pallas_src>

<mosaic_0001>
module attributes {stable_mosaic.version = 11 : i64} {
  func.func @_proj_cf_kernel(%arg0: i32, %arg1: memref<32x64xf32, #tpu.memory_space<vmem>>, %arg2: memref<1x64x4xf32, #tpu.memory_space<vmem>>, %arg3: memref<1x32x4xf32, #tpu.memory_space<vmem>>) attributes {dimension_semantics = [#tpu.dimension_semantics<parallel>], iteration_bounds = array<i64: 2>, scalar_prefetch = 0 : i64, scratch_operands = 0 : i64, tpu.core_type = #tpu.core_type<tc>, window_params = [{pipeline_mode = #tpu.pipeline_mode<synchronous>, transform_indices = @transform_0, window_bounds = array<i64: 32, 64>}, {transform_indices = @transform_1, window_bounds = array<i64: 1, 64, 4>}, {transform_indices = @transform_2, window_bounds = array<i64: 1, 32, 4>}]} {
    %c0 = arith.constant 0 : index
    %c0_0 = arith.constant 0 : index
    %0 = vector.load %arg1[%c0, %c0_0] : memref<32x64xf32, #tpu.memory_space<vmem>>, vector<32x64xf32>
    %c0_1 = arith.constant 0 : index
    %c0_2 = arith.constant 0 : index
    %c0_3 = arith.constant 0 : index
    %1 = vector.load %arg2[%c0_1, %c0_2, %c0_3] : memref<1x64x4xf32, #tpu.memory_space<vmem>>, vector<1x64x4xf32>
    %2 = vector.shape_cast %1 : vector<1x64x4xf32> to vector<64x4xf32>
    %cst = arith.constant dense<0.000000e+00> : vector<32x4xf32>
    %3 = tpu.matmul %0, %2, %cst {dimension_numbers = #tpu.dot_dimension_numbers<[1], [0], [0], [1], [0, 0, 1, 1], [], []>} : vector<32x64xf32>, vector<64x4xf32>, vector<32x4xf32> -> vector<32x4xf32>
    %c0_4 = arith.constant 0 : index
    %c0_5 = arith.constant 0 : index
    %c0_6 = arith.constant 0 : index
    %4 = vector.load %arg3[%c0_4, %c0_5, %c0_6] : memref<1x32x4xf32, #tpu.memory_space<vmem>>, vector<1x32x4xf32>
    %5 = vector.shape_cast %4 : vector<1x32x4xf32> to vector<32x4xf32>
    %6 = vector.shape_cast %3 : vector<32x4xf32> to vector<1x32x4xf32>
    tpu.vector_store %arg3[%c0_4, %c0_5, %c0_6], %6 {strides = array<i32>} : memref<1x32x4xf32, #tpu.memory_space<vmem>>, vector<1x32x4xf32>,
    return
  }
  func.func @transform_0(%arg0: i32) -> (i32, i32) {
    %c0_i32 = arith.constant 0 : i32
    %c0_i32_0 = arith.constant 0 : i32
    %c0_i32_1 = arith.constant 0 : i32
    return %c0_i32, %c0_i32_0 : i32, i32
  }
  func.func @transform_1(%arg0: i32) -> (i32, i32, i32) {
    %c0_i32 = arith.constant 0 : i32
    %c0_i32_0 = arith.constant 0 : i32
    %c0_i32_1 = arith.constant 0 : i32
    return %arg0, %c0_i32, %c0_i32_0 : i32, i32, i32
  }
  func.func @transform_2(%arg0: i32) -> (i32, i32, i32) {
    %c0_i32 = arith.constant 0 : i32
    %c0_i32_0 = arith.constant 0 : i32
    %c0_i32_1 = arith.constant 0 : i32
    return %arg0, %c0_i32, %c0_i32_0 : i32, i32, i32
  }
}

</mosaic_0001>

<bundles_post_ra>
// kernel: tpu_custom_call.1
= control target key start
LH: loop header
LB: loop body
LE: loop exit
PB: predicated region body
PF: predicated region fallthrough
CT: control target
= control target key end

     0   :  { %s330_s9 = smov 0   ;;  %s363_s0 = inlined_call_operand.vmem [shape: f32[32,64], index: 0, kind: input, shape index: {}]   ;;  %s364_s1 = inlined_call_operand.vmem [shape: f32[2,64,4], index: 1, kind: input, shape index: {}]   ;;  %s365_s2 = inlined_call_operand.vmem [shape: f32[2,32,4], index: 2, kind: output, shape index: {}]  }
   0x1 LB: > { %s258_s10 = sadd.s32 4294967295, %s313_s9   ;;  %p262_p0 = scmp.ge.s32.totalorder %s313_s9, 1  ;;  %s313_s9 = sphi %s330_s9, %s12_s9  }
   0x2   : > { %p112_p1 = scmp.lt.s32.totalorder %s313_s9, 3 }
   0x4   : > { %p113_p2 = pnand %p262_p0, %p112_p1 }
   0x5   : > { %p134_p3 = scmp.lt.s32.totalorder (!%p113_p2), %s258_s10, 1 }
   0x6   : > { %116 = sbr.rel (%p113_p2) target bundleno = 164 (0xa4), region = 28 }
   0xb   : > { %s367_s10 = smov (!%p134_p3, %s258_s10), 1  ;;  %v146_v8 = vld [vmem:[%s363_s0 + $0x10] sm:$0xff]  ;;  %vm156_vm0 = vcmask 523264   ;;  %v147_v9 = vld [vmem:[%s363_s0 + $0x18] sm:$0xff]  ;;  %v144_v10 = vld [vmem:[%s363_s0] sm:$0xff]  ;;  %vm198_vm1 = vcmask 31744  }
   0xc   : > { %s273_s11 = sshll.u32 %s367_s10, 6  ;;  %v145_v11 = vld [vmem:[%s363_s0 + $0x8] sm:$0xff]  ;;  %s274_s23 = sshll.u32 %s367_s10, 5 }
   0xd   : > { %s138_s14 = scalar_lea.vmem %s364_s1, %s273_s11  ;;  %s143_s26 = scalar_lea.vmem %s365_s2, %s274_s23 }
   0xe   : > { %v155_v0 = vld [vmem:[%s138_s14 + $0x38] sm:$0xff]  ;;  %v154_v1 = vld [vmem:[%s138_s14 + $0x30] sm:$0xff]  ;;  %v153_v2 = vld [vmem:[%s138_s14 + $0x28] sm:$0xff] }
   0xf   : > { %276 = vmatpush.msra.mxu2 %v155_v0  ;;  %277 = vmatpush.msra.mxu3 %v155_v0  ;;  %v152_v3 = vld [vmem:[%s138_s14 + $0x20] sm:$0xff]  ;;  %v151_v4 = vld [vmem:[%s138_s14 + $0x18] sm:$0xff]  ;;  %v150_v5 = vld [vmem:[%s138_s14 + $0x10] sm:$0xff] }
  0x10   : > { %177 = vmatpush.msra.mxu0 %v155_v0  ;;  %275 = vmatpush.msra.mxu1 %v155_v0  ;;  %v149_v6 = vld [vmem:[%s138_s14 + $0x8] sm:$0xff]  ;;  %v148_v7 = vld [vmem:[%s138_s14] sm:$0xff] }
  0x11   : > { %279 = vmatpush.msra.mxu2 %v154_v1  ;;  %280 = vmatpush.msra.mxu3 %v154_v1 }
  0x12   : > { %178 = vmatpush.msra.mxu0 %v154_v1  ;;  %278 = vmatpush.msra.mxu1 %v154_v1 }
  0x13   : > { %282 = vmatpush.msra.mxu2 %v153_v2  ;;  %283 = vmatpush.msra.mxu3 %v153_v2 }
  0x14   : > { %179 = vmatpush.msra.mxu0 %v153_v2  ;;  %281 = vmatpush.msra.mxu1 %v153_v2 }
  0x15   : > { %285 = vmatpush.msra.mxu2 %v152_v3  ;;  %286 = vmatpush.msra.mxu3 %v152_v3 }
  0x16   : > { %180 = vmatpush.msra.mxu0 %v152_v3  ;;  %284 = vmatpush.msra.mxu1 %v152_v3 }
  0x17   : > { %288 = vmatpush.msra.mxu2 %v151_v4  ;;  %289 = vmatpush.msra.mxu3 %v151_v4 }
  0x18   : > { %181 = vmatpush.msra.mxu0 %v151_v4  ;;  %287 = vmatpush.msra.mxu1 %v151_v4 }
  0x19   : > { %291 = vmatpush.msra.mxu2 %v150_v5  ;;  %292 = vmatpush.msra.mxu3 %v150_v5 }
  0x1a   : > { %182 = vmatpush.msra.mxu0 %v150_v5  ;;  %290 = vmatpush.msra.mxu1 %v150_v5 }
  0x1b   : > { %294 = vmatpush.msra.mxu2 %v149_v6  ;;  %295 = vmatpush.msra.mxu3 %v149_v6 }
  0x1c   : > { %183 = vmatpush.msra.mxu0 %v149_v6  ;;  %293 = vmatpush.msra.mxu1 %v149_v6 }
  0x1d   : > { %297 = vmatpush.msra.mxu2 %v148_v7  ;;  %298 = vmatpush.msra.mxu3 %v148_v7 }
  0x1e   : > { %269 = vmatmul.msk.f32.vlgmr.msra.gmra.mxu2 %vm156_vm0, %v146_v8  ;;  %270 = vmatmul.msk.f32.vlgmr.msra.gmra.mxu3 %vm156_vm0, %v147_v9 }
  0x1f   : > { %184 = vmatpush.msra.mxu0 %v148_v7  ;;  %296 = vmatpush.msra.mxu1 %v148_v7 }
  0x20   : > { %267 = vmatmul.msk.f32.vlgmr.msra.gmra.mxu0 %vm156_vm0, %v144_v10  ;;  %268 = vmatmul.msk.f32.vlgmr.msra.gmra.mxu1 %vm156_vm0, %v145_v11 }
  0x9d   : > { %v186_v12 = vpop.f32.mrf.mxu0  ;;  %v189_v13 = vpop.f32.mrf.mxu1 }
  0x9e   : > { %199 = vst.msk [vmem:[%s143_s26] sm:$0xff] %vm198_vm1, %v186_v12 }
  0x9f   : > { %200 = vst.msk [vmem:[%s143_s26 + $0x8] sm:$0xff] %vm198_vm1, %v189_v13 }
  0xa1   : > { %v192_v14 = vpop.f32.mrf.mxu2  ;;  %v195_v15 = vpop.f32.mrf.mxu3 }
  0xa2   : > { %201 = vst.msk [vmem:[%s143_s26 + $0x10] sm:$0xff] %vm198_vm1, %v192_v14 }
  0xa3   : > { %202 = vst.msk [vmem:[%s143_s26 + $0x18] sm:$0xff] %vm198_vm1, %v195_v15 }
  0xa4 PF: > { %s12_s9 = sadd.s32 1, %s313_s9  }
  0xa5   : > { %p9_p4 = scmp.ge.s32.totalorder %s12_s9, 4  }
  0xa7   :  { %11 = sbr.rel (!%p9_p4) target bundleno = 1 (0x1), region = 58 }

</bundles_post_ra>
